<compile_context>
chip_gen: v7x
topology: tpu7x:2x2x1
jax: 0.10.0
libtpu: 0.0.40
codegen_flags: <defaults>
</compile_context>

<pallas_src>
import math
import functools

import jax
import jax.numpy as jnp
from jax.experimental import pallas as pl
from jax.experimental.pallas import tpu as pltpu


def _pos_enc_kernel(x_ref, pe_ref, o_ref, *, scale, compute_dtype):
    # x_ref/o_ref: (TB, R, C); pe_ref: (R, C), broadcast over the batch dim.
    x = x_ref[...].astype(compute_dtype)
    pe = pe_ref[...].astype(compute_dtype)
    o_ref[...] = (x * scale + pe[None, :, :]).astype(o_ref.dtype)


def _vmem_budget_bytes():
    """(pipeline-buffer budget, vmem_limit_bytes), generation-aware."""
    cap = None
    try:
        cap = getattr(pltpu.get_tpu_info(), "vmem_capacity_bytes", None)
    except Exception:
        cap = None
    if not cap:
        cap = 64 * 1024 * 1024                       # conservative: v7x physical per-core
    budget = min(24 * 1024 * 1024, cap // 3)         # v5e/v6e: 24 MiB, v7x: ~21 MiB
    vmem_limit = int(min(cap * 3 // 4, budget + 8 * 1024 * 1024))
    return int(budget), vmem_limit


def learnable_position_encode(x, pe, d_model, *, donate_x=False, tile_budget_bytes=None):
    """x: (B, S, D), pe: (1, max_seq_len, D) -> (B, S, D).

    Equivalent to `x * sqrt(d_model) + pe[:, :S]` (dropout == identity).
    """
    B, S, D = x.shape
    assert D == d_model
    assert pe.shape[0] == 1 and pe.shape[1] >= S and pe.shape[2] == D

    scale = math.sqrt(d_model)
    itemsize = jnp.dtype(x.dtype).itemsize
    pe_itemsize = jnp.dtype(pe.dtype).itemsize
    # Same dtype -> compute natively (bf16 VALU on v6e/v7x; Mosaic casts on v5e).
    # Mixed dtypes (e.g. bf16 x + f32 pe) -> promote to f32 in-register.
    compute_dtype = x.dtype if x.dtype == pe.dtype else jnp.float32

    # --- choose a lane-dense 2-D layout per batch ----------------------------
    if D % 128 != 0 and (S * D) % 128 == 0:
        # Fold D into the lane axis: (S, D) plane -> (S*D/128, 128) slabs so all
        # stores are unmasked full-128-lane vst's.
        cols = 128
        rows = (S * D) // 128
        x_in = x.reshape(B, rows, cols)
        pe_in = pe.reshape(-1)[: S * D].reshape(rows, cols)     # tiny one-time copy
    else:
        # D already lane-dense (multiple of 128), or un-foldable.
        # TODO(synk): when D % 128 != 0 and (S*D) % 128 != 0 the stores are
        # masked partial-lane vst.msk; pad D to a multiple of 128 upstream if
        # that case is ever hot.
        cols = D
        rows = S
        x_in = x
        pe_in = pe.reshape(pe.shape[1], D)[:S]                  # S*D-byte prefix slice

    budget, vmem_limit = _vmem_budget_bytes()
    if tile_budget_bytes is not None:
        budget = int(tile_budget_bytes)

    plane_bytes = rows * cols * itemsize
    pe_bytes = rows * cols * pe_itemsize
    kernel = functools.partial(_pos_enc_kernel, scale=scale, compute_dtype=compute_dtype)
    cost = pl.CostEstimate(
        flops=2 * B * S * D,
        transcendentals=0,
        bytes_accessed=2 * B * S * D * itemsize + S * D * pe_itemsize,
    )
    io_alias = {0: 0} if donate_x else {}

    if 4 * plane_bytes + 2 * pe_bytes <= budget:
        # ---- full-plane path: pe resident (constant block index -> fetched
        # once), TB whole batch planes streamed per grid step.
        tb = int(max(1, min(B, (budget - 2 * pe_bytes) // max(1, 4 * plane_bytes))))
        out = pl.pallas_call(
            kernel,
            out_shape=jax.ShapeDtypeStruct((B, rows, cols), x.dtype),
            grid=(pl.cdiv(B, tb),),
            in_specs=[
                pl.BlockSpec((tb, rows, cols), lambda i: (i, 0, 0)),
                pl.BlockSpec((rows, cols), lambda i: (0, 0)),       # resident pe
            ],
            out_specs=pl.BlockSpec((tb, rows, cols), lambda i: (i, 0, 0)),
            compiler_params=pltpu.CompilerParams(
                dimension_semantics=("parallel",),
                vmem_limit_bytes=vmem_limit,
            ),
            cost_estimate=cost,
            input_output_aliases=io_alias,
        )(x_in, pe_in)
    else:
        # ---- row-tiled path for big planes: grid = (row_tiles, B), B fastest,
        # so pe's block index (r, 0) is unchanged across the inner batch loop
        # and is not re-fetched (total pe traffic == one read of pe[:S]).
        per_row = (4 * itemsize + 2 * pe_itemsize) * cols      # x,out dbl-buf + pe dbl-buf
        tr = max(8, min(rows, budget // per_row))
        tr = max(8, tr - (tr % 8))
        out = pl.pallas_call(
            kernel,
            out_shape=jax.ShapeDtypeStruct((B, rows, cols), x.dtype),
            grid=(pl.cdiv(rows, tr), B),
            in_specs=[
                pl.BlockSpec((1, tr, cols), lambda r, b: (b, r, 0)),
                pl.BlockSpec((tr, cols), lambda r, b: (r, 0)),      # constant over b
            ],
            out_specs=pl.BlockSpec((1, tr, cols), lambda r, b: (b, r, 0)),
            compiler_params=pltpu.CompilerParams(
                dimension_semantics=("parallel", "parallel"),
                vmem_limit_bytes=vmem_limit,
            ),
            cost_estimate=cost,
            input_output_aliases=io_alias,
        )(x_in, pe_in)

    return out.reshape(B, S, D)


if __name__ == "__main__":
    MAX_SEQ_LEN = 200
    key = jax.random.PRNGKey(0)
    k_x, k_pe, k_x2, k_pe2, k_x3, k_pe3 = jax.random.split(key, 6)

    # Test 1: small d_model -> lane-dense slab fast path, batch-packed.
    B, S, D = 2, 8, 32
    x = jax.random.normal(k_x, (B, S, D), dtype=jnp.float32)
    pe = jax.random.uniform(k_pe, (1, MAX_SEQ_LEN, D), dtype=jnp.float32)
    out = jax.block_until_ready(learnable_position_encode(x, pe, d_model=D))
    ref = x * math.sqrt(D) + pe[:, :S, :]
    assert out.shape == (B, S, D)
    assert jnp.allclose(out, ref, atol=1e-5, rtol=1e-5)

    # Test 2: lane-aligned d_model -> general (S, D) layout, resident-pe path.
    B2, S2, D2 = 2, 16, 128
    x2 = jax.random.normal(k_x2, (B2, S2, D2), dtype=jnp.float32)
    pe2 = jax.random.uniform(k_pe2, (1, MAX_SEQ_LEN, D2), dtype=jnp.float32)
    out2 = jax.block_until_ready(learnable_position_encode(x2, pe2, d_model=D2))
    ref2 = x2 * math.sqrt(D2) + pe2[:, :S2, :]
    assert jnp.allclose(out2, ref2, atol=1e-5, rtol=1e-5)

    # Test 3: force the big-plane row-tiled path (tiny tile budget) to exercise
    # the (row_tiles, B) grid with pe re-fetch elision + partial last tile.
    out3 = jax.block_until_ready(
        learnable_position_encode(x2, pe2, d_model=D2, tile_budget_bytes=32 * 1024)
    )
    assert jnp.allclose(out3, ref2, atol=1e-5, rtol=1e-5)

    # Test 4: odd D with S*D not a multiple of 128 (masked-store fallback path).
    B4, S4, D4 = 3, 5, 48
    x4 = jax.random.normal(k_x3, (B4, S4, D4), dtype=jnp.float32)
    pe4 = jax.random.uniform(k_pe3, (1, MAX_SEQ_LEN, D4), dtype=jnp.float32)
    out4 = jax.block_until_ready(learnable_position_encode(x4, pe4, d_model=D4))
    ref4 = x4 * math.sqrt(D4) + pe4[:, :S4, :]
    assert jnp.allclose(out4, ref4, atol=1e-5, rtol=1e-5)

    print("KERNEL_OK")
</pallas_src>

<mosaic_0001>
module attributes {stable_mosaic.version = 11 : i64} {
  func.func @_pos_enc_kernel(%arg0: i32, %arg1: memref<2x2x128xf32, #tpu.memory_space<vmem>>, %arg2: memref<2x128xf32, #tpu.memory_space<vmem>>, %arg3: memref<2x2x128xf32, #tpu.memory_space<vmem>>) attributes {dimension_semantics = [#tpu.dimension_semantics<parallel>], iteration_bounds = array<i64: 1>, scalar_prefetch = 0 : i64, scratch_operands = 0 : i64, tpu.core_type = #tpu.core_type<tc>, window_params = [{transform_indices = @transform_0, window_bounds = array<i64: 2, 2, 128>}, {pipeline_mode = #tpu.pipeline_mode<synchronous>, transform_indices = @transform_1, window_bounds = array<i64: 2, 128>}, {transform_indices = @transform_2, window_bounds = array<i64: 2, 2, 128>}]} {
    %c0 = arith.constant 0 : index
    %c0_0 = arith.constant 0 : index
    %c0_1 = arith.constant 0 : index
    %0 = vector.load %arg1[%c0, %c0_0, %c0_1] : memref<2x2x128xf32, #tpu.memory_space<vmem>>, vector<2x2x128xf32>
    %c0_2 = arith.constant 0 : index
    %c0_3 = arith.constant 0 : index
    %1 = vector.load %arg2[%c0_2, %c0_3] : memref<2x128xf32, #tpu.memory_space<vmem>>, vector<2x128xf32>
    %cst = arith.constant 5.65685415 : f32
    %2 = vector.broadcast %cst : f32 to vector<2x2x128xf32>
    %3 = arith.mulf %0, %2 : vector<2x2x128xf32>
    %4 = vector.shape_cast %1 : vector<2x128xf32> to vector<1x2x128xf32>
    %5 = vector.broadcast %4 : vector<1x2x128xf32> to vector<2x2x128xf32>
    %6 = arith.addf %3, %5 : vector<2x2x128xf32>
    %c0_4 = arith.constant 0 : index
    %c0_5 = arith.constant 0 : index
    %c0_6 = arith.constant 0 : index
    %7 = vector.load %arg3[%c0_4, %c0_5, %c0_6] : memref<2x2x128xf32, #tpu.memory_space<vmem>>, vector<2x2x128xf32>
    tpu.vector_store %arg3[%c0_4, %c0_5, %c0_6], %6 {strides = array<i32>} : memref<2x2x128xf32, #tpu.memory_space<vmem>>, vector<2x2x128xf32>,
    return
  }
  func.func @transform_0(%arg0: i32) -> (i32, i32, i32) {
    %c0_i32 = arith.constant 0 : i32
    %c0_i32_0 = arith.constant 0 : i32
    %c0_i32_1 = arith.constant 0 : i32
    return %arg0, %c0_i32, %c0_i32_0 : i32, i32, i32
  }
  func.func @transform_1(%arg0: i32) -> (i32, i32) {
    %c0_i32 = arith.constant 0 : i32
    %c0_i32_0 = arith.constant 0 : i32
    %c0_i32_1 = arith.constant 0 : i32
    return %c0_i32, %c0_i32_0 : i32, i32
  }
  func.func @transform_2(%arg0: i32) -> (i32, i32, i32) {
    %c0_i32 = arith.constant 0 : i32
    %c0_i32_0 = arith.constant 0 : i32
    %c0_i32_1 = arith.constant 0 : i32
    return %arg0, %c0_i32, %c0_i32_0 : i32, i32, i32
  }
}

</mosaic_0001>

<bundles_post_ra>
// kernel: tpu_custom_call.1
= control target key start
LH: loop header
LB: loop body
LE: loop exit
PB: predicated region body
PF: predicated region fallthrough
CT: control target
= control target key end

     0   :  { %7 = vsyncpa [#allocation3], 0  ;;  %s156_s0 = inlined_call_operand.hbm [shape: f32[2,2,128], index: 0, kind: input, shape index: {}]   ;;  %s157_s1 = inlined_call_operand.vmem [shape: f32[2,128], index: 1, kind: input, shape index: {}]   ;;  %s158_s2 = inlined_call_operand.hbm [shape: f32[2,2,128], index: 2, kind: output, shape index: {}]  }
   0x1   :  { %8 = vsyncpa [#allocation4], 0  ;;  %s104_s9 = smov [#allocation2]   ;;  %s56_s13 = scalar_lea.hbm %s156_s0, 64 }
   0x2   :  { %s14_s10 = sshll.u32 %s104_s9, 4  ;;  %p57_p0 = scmp.ne.s32.totalorder %s156_s0, %s56_s13  ;;  %s15_s10 = int_to_ptr.vmem [resolvable:$true] %s14_s10 }
   0x3   :  { %p60_p1 = scmp.lt.u32.totalorder %s56_s13, %s156_s0 }
   0x5   :  { %p62_p2 = pnand %p60_p1, %p57_p0 }
   0x7   :  { %65 = shalt.err (!%p62_p2)
}
   0x8   :  { %s66_s18 = scalar_lea.vmem %s15_s10, 64  ;;  %p71_p4 = scmp.lt.s32.totalorder %s15_s10, %s15_s10 }
   0x9   :  { %p67_p3 = scmp.ne.s32.totalorder %s15_s10, %s66_s18  ;;  %p72_p5 = scmp.lt.s32.totalorder %s66_s18, %s66_s18 }
   0xb   :  { %p73_p6 = por %p72_p5, %p71_p4 }
   0xd   :  { %p74_p7 = pnand %p73_p6, %p67_p3 }
   0xf   :  { %77 = shalt.err (!%p74_p7)
}
  0x10   :  { %s105_s19 = smov 32   ;;  %s106_s20 = smov 2  }
  0x11   :  { %20 = dma.hbm_to_vmem [thread:$0]  %s156_s0, 64, %s15_s10, [#allocation3], %s105_s19, %s105_s19, %s106_s20  }
  0x12   :  { %100 = dma.done.wait [#allocation3], 64  }
  0x13   :  { %101 = vsyncadd [#allocation3], 4294967232  ;;  %s107_s23 = smov [#allocation5]   ;;  %v26_v0 = vld [vmem:[#allocation2] sm:$0x3] }
  0x14   :  { %s40_s24 = sshll.u32 %s107_s23, 4  ;;  %v28_v1 = vld [vmem:[%s157_s1] sm:$0x3]  ;;  %v27_v2 = vld [vmem:[#allocation2 + $0x2] sm:$0x3]  ;;  %s41_s24 = int_to_ptr.vmem [resolvable:$true] %s40_s24 }
  0x15   :  { %v29_v3 = vmul.f32 5.656854, %v26_v0  ;;  %v30_v4 = vmul.f32 5.656854, %v27_v2  ;;  %s78_s27 = scalar_lea.vmem %s41_s24, 64  ;;  %p83_p9 = scmp.lt.s32.totalorder %s41_s24, %s41_s24 }
  0x16   :  { %p79_p8 = scmp.ne.s32.totalorder %s41_s24, %s78_s27  ;;  %p84_p10 = scmp.lt.s32.totalorder %s78_s27, %s78_s27 }
  0x17   :  { %v31_v5 = vadd.f32 %v29_v3, %v28_v1  ;;  %v32_v6 = vadd.f32 %v30_v4, %v28_v1 }
  0x18   :  { %p85_p11 = por %p84_p10, %p83_p9 }
  0x19   :  { %33 = vst [vmem:[#allocation5] sm:$0x3] %v31_v5  ;;  %34 = vst [vmem:[#allocation5 + $0x2] sm:$0x3] %v32_v6 }
  0x1a   :  { %p86_p12 = pnand %p85_p11, %p79_p8 }
  0x1c   :  { %89 = shalt.err (!%p86_p12)
}
  0x1d   :  { %s90_s29 = scalar_lea.hbm %s158_s2, 64 }
  0x1e   :  { %p91_p13 = scmp.ne.s32.totalorder %s158_s2, %s90_s29  ;;  %p94_p0 = scmp.lt.u32.totalorder %s90_s29, %s158_s2 }
  0x20   :  { %p96_p1 = pnand %p94_p0, %p91_p13 }
  0x22   :  { %99 = shalt.err (!%p96_p1)
}
  0x23   :  { %46 = dma.vmem_to_hbm [thread:$0]  %s41_s24, 64, %s158_s2, [#allocation4], %s105_s19, %s105_s19, %s106_s20  }
  0x24   :  { %102 = dma.done.wait [#allocation4], 64  }
  0x25   :  { %103 = vsyncadd [#allocation4], 4294967232 }
  0x26   :  { %50 = vsyncpa [#allocation3], 1 }
  0x27   :  { %51 = vsyncpa [#allocation4], 1 }

</bundles_post_ra>
